<compile_context>
chip_gen: v7x
topology: tpu7x:2x2x1
jax: 0.10.0
libtpu: 0.0.40
codegen_flags: <defaults>
</compile_context>

<pallas_src>
import functools

import jax
import jax.numpy as jnp
import numpy as np
from jax.experimental import pallas as pl
from jax.experimental.pallas import tpu as pltpu


def _cdiv(a, b):
    return -(-a // b)


def _col_sum(v, n_groups=8):
    """(1, L) f32 -> (1, 1) sum over lanes, with a few independent reduce
    chains for ILP and 128-aligned static slices (no relayouts)."""
    L = v.shape[-1]
    n_chunks = L // 128
    k = min(n_groups, max(1, n_chunks))
    bounds = [(i * n_chunks) // k for i in range(k + 1)]
    parts = []
    for i in range(k):
        lo, hi = bounds[i] * 128, bounds[i + 1] * 128
        parts.append(jnp.sum(v[:, lo:hi], axis=-1, keepdims=True))
    tot = parts[0]
    for p in parts[1:]:
        tot = tot + p
    return tot


def _ce_kernel(*refs, compute_roll, compute_den, has_weight, hw, n_j):
    # Ref layout (path-specialized):
    #   [rolled_idx SMEM prefetch]            if compute_roll (index_map only)
    #   x_ref  : (1, C, THW)   logits, native dtype
    #   t_ref  : (1, 1, THW)   int32 targets
    #   [tr_ref: (1, 1, THW)]  targets of the rolled batch row, if compute_roll
    #   [w_ref : (C, 1)]       class weights, if has_weight
    #   out0   : (1, 1, 1, 128)  f32 accumulator, resident across HW tiles
    #   [out1  : (1, 1, 1, 128)] roll stream or weighted-denominator stream
    pos = 0
    if compute_roll:
        _rolled_smem = refs[pos]  # noqa: F841  (consumed by index_maps only)
        pos += 1
    x_ref = refs[pos]; pos += 1
    t_ref = refs[pos]; pos += 1
    tr_ref = None
    if compute_roll:
        tr_ref = refs[pos]; pos += 1
    w_ref = None
    if has_weight:
        w_ref = refs[pos]; pos += 1
    out0_ref = refs[pos]; pos += 1
    out1_ref = refs[pos] if (compute_roll or compute_den) else None

    g = pl.program_id(1)
    j = pl.program_id(2)

    x = x_ref[0].astype(jnp.float32)               # (C, THW), cast in-kernel
    C, THW = x.shape

    # numerically stable log-softmax pieces over the class (sublane) axis
    m = jnp.max(x, axis=0, keepdims=True)          # (1, THW)
    z = x - m
    lse = jnp.log(jnp.sum(jnp.exp(z), axis=0, keepdims=True))   # (1, THW)

    cls_idx = jax.lax.broadcasted_iota(jnp.int32, (C, 1), 0)
    w_col = w_ref[...] if has_weight else None     # (C, 1)

    # validity of each lane: handles the partial tail block (hw not a
    # multiple of thw / 128) and any clamped duplicate block of the group
    # split — garbage lanes are selected to exactly 0 (where, not multiply,
    # so NaN/Inf in unspecified padding never propagates).
    lane = jax.lax.broadcasted_iota(jnp.int32, (1, THW), 1)
    base = (g * n_j + j) * THW
    valid = (base + lane) < hw                     # (1, THW) bool

    def picked_stream(t_row):
        # -log_softmax picked at the target class of each pixel, optionally
        # scaled by weight[target] — all (1, THW), no (C, THW) materialization
        # beyond one select.
        mask = cls_idx == t_row                    # (C, THW)
        pz = jnp.sum(jnp.where(mask, z, 0.0), axis=0, keepdims=True)
        nll = lse - pz                             # (1, THW)
        if has_weight:
            wp = jnp.sum(jnp.where(mask, w_col, 0.0), axis=0, keepdims=True)
            return nll * wp, wp
        return nll, None

    nll0, w0 = picked_stream(t_ref[0])
    s0 = _col_sum(jnp.where(valid, nll0, 0.0))     # (1, 1)

    @pl.when(j == 0)
    def _init():
        out0_ref[...] = jnp.zeros_like(out0_ref)
        if out1_ref is not None:
            out1_ref[...] = jnp.zeros_like(out1_ref)

    out0_ref[0, 0] += s0
    if compute_roll:
        nll1, _ = picked_stream(tr_ref[0])
        out1_ref[0, 0] += _col_sum(jnp.where(valid, nll1, 0.0))
    elif compute_den:
        out1_ref[0, 0] += _col_sum(jnp.where(valid, w0, 0.0))


def ce_loss(logits_nchw, target, weight=None, alpha=None, rolled=None,
            hw_tile=None):
    """Pallas implementation of CELoss.forward.

    logits_nchw: (bs, cl, h, w) float (any float dtype; cast to f32 in-kernel)
    target     : (bs, h, w) int
    weight     : optional (cl,) float (constructor arg of the torch module)
    alpha      : optional scalar
    rolled     : optional (bs,) int permutation
    hw_tile    : optional override of the HW tile size (lanes)
    """
    bs, cl, h, w = logits_nchw.shape
    hw = h * w

    mixup_path = not (alpha is None and rolled is None)
    compute_roll = (alpha is not None) and (rolled is not None)
    has_weight = weight is not None
    compute_den = (not mixup_path) and has_weight
    two_out = compute_roll or compute_den

    x = logits_nchw.reshape(bs, cl, hw)
    t = target.reshape(bs, 1, hw).astype(jnp.int32)

    # ---- tile-size selection: balanced tiles, no divisibility shrink, no
    # host-side padding copies.
    CAP_BYTES = 4 * 1024 * 1024          # native logits bytes per block
    itemsize = x.dtype.itemsize
    bytes_per_lane = cl * itemsize
    hw128 = _cdiv(hw, 128) * 128
    if hw_tile is not None:
        thw = max(128, _cdiv(min(hw_tile, hw128), 128) * 128)
    else:
        max_lanes = max(128, (CAP_BYTES // bytes_per_lane) // 128 * 128)
        n_t = _cdiv(hw128, max_lanes)
        thw = _cdiv(_cdiv(hw128, n_t), 128) * 128
    n_hw = _cdiv(hw, thw)

    # v7x dual-core at small batch: split HW tiles over a parallel group axis.
    n_groups = 2 if (bs < 4 and n_hw >= 2) else 1
    n_j = _cdiv(n_hw, n_groups)
    grid = (bs, n_groups, n_j)

    last_blk = n_hw - 1
    needs_clamp = n_groups * n_j > n_hw

    def hw_blk(g, j):
        blk = g * n_j + j
        return jnp.minimum(blk, last_blk) if needs_clamp else blk

    if compute_roll:
        rolled_idx = jnp.asarray(rolled, dtype=jnp.int32).reshape(bs)
        num_prefetch = 1
        x_map = lambda b, g, j, r: (b, 0, hw_blk(g, j))
        t_map = lambda b, g, j, r: (b, 0, hw_blk(g, j))
        tr_map = lambda b, g, j, r: (r[b], 0, hw_blk(g, j))
        w_map = lambda b, g, j, r: (0, 0)
        out_map = lambda b, g, j, r: (b, g, 0, 0)
    else:
        num_prefetch = 0
        x_map = lambda b, g, j: (b, 0, hw_blk(g, j))
        t_map = lambda b, g, j: (b, 0, hw_blk(g, j))
        w_map = lambda b, g, j: (0, 0)
        out_map = lambda b, g, j: (b, g, 0, 0)

    in_specs = [pl.BlockSpec((1, cl, thw), x_map),
                pl.BlockSpec((1, 1, thw), t_map)]
    call_args = [x, t]
    if compute_roll:
        in_specs.append(pl.BlockSpec((1, 1, thw), tr_map))
        call_args.append(t)                 # same target array, rolled stream
    if has_weight:
        w_arr = jnp.asarray(weight, jnp.float32).reshape(cl, 1)
        in_specs.append(pl.BlockSpec((cl, 1), w_map))
        call_args.append(w_arr)
    if compute_roll:
        call_args = [rolled_idx] + call_args

    out_shapes = [jax.ShapeDtypeStruct((bs, n_groups, 1, 128), jnp.float32)]
    out_specs = [pl.BlockSpec((1, 1, 1, 128), out_map)]
    if two_out:
        out_shapes.append(jax.ShapeDtypeStruct((bs, n_groups, 1, 128),
                                               jnp.float32))
        out_specs.append(pl.BlockSpec((1, 1, 1, 128), out_map))

    n_streams = 2 if compute_roll else 1
    cost = pl.CostEstimate(
        flops=int(bs * hw * (cl * (5 + 2 * n_streams) + 12)),
        transcendentals=int(bs * hw * (cl + 1)),
        bytes_accessed=int(x.size * itemsize
                           + t.size * 4 * (2 if compute_roll else 1)
                           + (cl * 4 if has_weight else 0)
                           + bs * n_groups * 128 * 4 * (2 if two_out else 1)))

    outs = pl.pallas_call(
        functools.partial(_ce_kernel,
                          compute_roll=compute_roll,
                          compute_den=compute_den,
                          has_weight=has_weight,
                          hw=hw,
                          n_j=n_j),
        out_shape=tuple(out_shapes),
        grid_spec=pltpu.PrefetchScalarGridSpec(
            num_scalar_prefetch=num_prefetch,
            grid=grid,
            in_specs=in_specs,
            out_specs=tuple(out_specs),
        ),
        compiler_params=pltpu.CompilerParams(
            dimension_semantics=("parallel", "parallel", "arbitrary"),
            vmem_limit_bytes=48 * 1024 * 1024,
        ),
        cost_estimate=cost,
    )(*call_args)
    if not isinstance(outs, (tuple, list)):
        outs = (outs,)

    # tiny (bs, groups) partial sums -> final scalar; everything below is glue
    s0 = jnp.sum(outs[0][:, :, 0, 0], axis=1)        # (bs,)
    if two_out:
        s1 = jnp.sum(outs[1][:, :, 0, 0], axis=1)    # (bs,)

    if not mixup_path:
        # nn.CrossEntropyLoss(weight=weight)(input, target), reduction='mean'
        if has_weight:
            return jnp.sum(s0) / jnp.sum(s1)
        return jnp.sum(s0) / (bs * hw)

    # mixup / one-hot path: nll.mean(dim=(2,3)) [* weight] .sum(dim=1).mean()
    if compute_roll:
        a = jnp.asarray(alpha, jnp.float32)
        per_b = (a * s0 + (1.0 - a) * s1) / hw
    else:
        per_b = s0 / hw
    return jnp.mean(per_b)


# ----------------------------- pure-JAX reference ---------------------------
def ce_loss_ref(x, t, weight=None, alpha=None, rolled=None):
    if alpha is None and rolled is None:
        logp = jax.nn.log_softmax(x, axis=1)
        picked = jnp.take_along_axis(logp, t[:, None, :, :], axis=1)[:, 0]
        if weight is None:
            return -jnp.mean(picked)
        w_t = jnp.asarray(weight)[t]
        return jnp.sum(-picked * w_t) / jnp.sum(w_t)
    ohe = jax.nn.one_hot(t, x.shape[1], axis=1, dtype=jnp.float32)
    if alpha is not None and rolled is not None:
        ohe = alpha * ohe + (1.0 - alpha) * ohe[jnp.asarray(rolled)]
    logp = jax.nn.log_softmax(x, axis=1)
    nll = (-logp * ohe).mean(axis=(2, 3))
    if weight is not None:
        nll = nll * jnp.asarray(weight)[None, :]
    return jnp.mean(jnp.sum(nll, axis=1))


if __name__ == "__main__":
    key = jax.random.PRNGKey(0)
    k1, k2, k3, k4, k5, k6 = jax.random.split(key, 6)

    bs, cl, h, w = 2, 4, 16, 16
    logits = jax.random.normal(k1, (bs, cl, h, w), dtype=jnp.float32)
    target = jax.random.randint(k2, (bs, h, w), 0, cl, dtype=jnp.int32)

    weight = jnp.linspace(0.5, 1.5, cl, dtype=jnp.float32)
    alpha = 0.7
    rolled = jnp.roll(jnp.arange(bs), 1)

    def check(out, ref, rtol=1e-4, atol=1e-5):
        np.testing.assert_allclose(np.asarray(out), np.asarray(ref),
                                   rtol=rtol, atol=atol)

    # A: standard CrossEntropyLoss (no weight)
    check(jax.block_until_ready(ce_loss(logits, target)),
          ce_loss_ref(logits, target))

    # A': standard CrossEntropyLoss with class weights
    check(jax.block_until_ready(ce_loss(logits, target, weight=weight)),
          ce_loss_ref(logits, target, weight=weight))

    # B: mixup path (alpha + rolled) with class weights
    check(jax.block_until_ready(
              ce_loss(logits, target, weight=weight, alpha=alpha, rolled=rolled)),
          ce_loss_ref(logits, target, weight=weight, alpha=alpha, rolled=rolled))

    # B2: one-hot path with alpha only (no rolled) and weights
    check(jax.block_until_ready(
              ce_loss(logits, target, weight=weight, alpha=alpha)),
          ce_loss_ref(logits, target, weight=weight, alpha=alpha))

    # C: non-multiple-of-128 spatial size (partial tail block gating)
    hp, wp = 15, 15
    logits_p = jax.random.normal(k3, (bs, cl, hp, wp), dtype=jnp.float32)
    target_p = jax.random.randint(k4, (bs, hp, wp), 0, cl, dtype=jnp.int32)
    check(jax.block_until_ready(ce_loss(logits_p, target_p, weight=weight)),
          ce_loss_ref(logits_p, target_p, weight=weight))

    # D: bf16 logits (native-dtype DMA + in-kernel f32 upcast), mixup + roll
    logits_bf = logits.astype(jnp.bfloat16)
    check(jax.block_until_ready(
              ce_loss(logits_bf, target, weight=weight, alpha=alpha,
                      rolled=rolled)),
          ce_loss_ref(logits_bf.astype(jnp.float32), target, weight=weight,
                      alpha=alpha, rolled=rolled))

    # E: multi-tile HW axis + 2-group split + clamped duplicate block
    he, we = 24, 24
    logits_e = jax.random.normal(k5, (1, cl, he, we), dtype=jnp.float32)
    target_e = jax.random.randint(k6, (1, he, we), 0, cl, dtype=jnp.int32)
    rolled_e = jnp.zeros((1,), dtype=jnp.int32)
    check(jax.block_until_ready(
              ce_loss(logits_e, target_e, weight=weight, alpha=alpha,
                      rolled=rolled_e, hw_tile=128)),
          ce_loss_ref(logits_e, target_e, weight=weight, alpha=alpha,
                      rolled=rolled_e))

    print("KERNEL_OK")
</pallas_src>

<mosaic_0001>
module attributes {stable_mosaic.version = 11 : i64} {
  func.func @_ce_kernel(%arg0: i32, %arg1: i32, %arg2: i32, %arg3: memref<1x4x256xf32, #tpu.memory_space<vmem>>, %arg4: memref<1x1x256xi32, #tpu.memory_space<vmem>>, %arg5: memref<1x1x1x128xf32, #tpu.memory_space<vmem>>) attributes {dimension_semantics = [#tpu.dimension_semantics<parallel>, #tpu.dimension_semantics<parallel>, #tpu.dimension_semantics<arbitrary>], iteration_bounds = array<i64: 2, 1, 1>, scalar_prefetch = 0 : i64, scratch_operands = 0 : i64, tpu.core_type = #tpu.core_type<tc>, window_params = [{transform_indices = @transform_0, window_bounds = array<i64: 1, 4, 256>}, {transform_indices = @transform_1, window_bounds = array<i64: 1, 1, 256>}, {transform_indices = @transform_2, window_bounds = array<i64: 1, 1, 1, 128>}]} {
    %c0 = arith.constant 0 : index
    %c0_0 = arith.constant 0 : index
    %c0_1 = arith.constant 0 : index
    %0 = vector.load %arg3[%c0, %c0_0, %c0_1] : memref<1x4x256xf32, #tpu.memory_space<vmem>>, vector<1x4x256xf32>
    %1 = vector.shape_cast %0 : vector<1x4x256xf32> to vector<4x256xf32>
    %cst = arith.constant dense<0xFF800000> : vector<256xf32>
    %2 = vector.multi_reduction <maximumf>, %1, %cst [0] : vector<4x256xf32> to vector<256xf32>
    %3 = vector.shape_cast %2 : vector<256xf32> to vector<1x256xf32>
    %4 = vector.broadcast %3 : vector<1x256xf32> to vector<4x256xf32>
    %5 = arith.subf %1, %4 : vector<4x256xf32>
    %6 = math.exp %5 : vector<4x256xf32>
    %cst_2 = arith.constant dense<0.000000e+00> : vector<256xf32>
    %7 = vector.multi_reduction <add>, %6, %cst_2 [0] : vector<4x256xf32> to vector<256xf32>
    %8 = vector.shape_cast %7 : vector<256xf32> to vector<1x256xf32>
    %9 = math.log %8 : vector<1x256xf32>
    %10 = tpu.iota {dimensions = array<i32: 0>} : vector<4x1xi32>
    %11 = tpu.iota {dimensions = array<i32: 1>} : vector<1x256xi32>
    %c1_i32 = arith.constant 1 : i32
    %12 = arith.muli %arg1, %c1_i32 : i32
    %13 = arith.addi %12, %arg2 : i32
    %c256_i32 = arith.constant 256 : i32
    %14 = arith.muli %13, %c256_i32 : i32
    %15 = vector.broadcast %14 : i32 to vector<1x256xi32>
    %16 = arith.addi %15, %11 : vector<1x256xi32>
    %c256_i32_3 = arith.constant 256 : i32
    %17 = vector.broadcast %c256_i32_3 : i32 to vector<1x256xi32>
    %18 = arith.cmpi slt, %16, %17 : vector<1x256xi32>
    %c0_4 = arith.constant 0 : index
    %c0_5 = arith.constant 0 : index
    %c0_6 = arith.constant 0 : index
    %19 = vector.load %arg4[%c0_4, %c0_5, %c0_6] : memref<1x1x256xi32, #tpu.memory_space<vmem>>, vector<1x1x256xi32>
    %20 = vector.shape_cast %19 : vector<1x1x256xi32> to vector<1x256xi32>
    %21 = vector.broadcast %10 : vector<4x1xi32> to vector<4x256xi32>
    %22 = vector.broadcast %20 : vector<1x256xi32> to vector<4x256xi32>
    %23 = arith.cmpi eq, %21, %22 : vector<4x256xi32>
    %cst_7 = arith.constant 0.000000e+00 : f32
    %24 = vector.broadcast %cst_7 : f32 to vector<4x256xf32>
    %25 = arith.select %23, %5, %24 : vector<4x256xi1>, vector<4x256xf32>
    %cst_8 = arith.constant dense<0.000000e+00> : vector<256xf32>
    %26 = vector.multi_reduction <add>, %25, %cst_8 [0] : vector<4x256xf32> to vector<256xf32>
    %27 = vector.shape_cast %26 : vector<256xf32> to vector<1x256xf32>
    %28 = arith.subf %9, %27 : vector<1x256xf32>
    %cst_9 = arith.constant 0.000000e+00 : f32
    %29 = vector.broadcast %cst_9 : f32 to vector<1x256xf32>
    %30 = arith.select %18, %28, %29 : vector<1x256xi1>, vector<1x256xf32>
    %31 = vector.extract_strided_slice %30 {offsets = [0, 0], sizes = [1, 128], strides = [1, 1]} : vector<1x256xf32> to vector<1x128xf32>
    %cst_10 = arith.constant dense<0.000000e+00> : vector<1xf32>
    %32 = vector.multi_reduction <add>, %31, %cst_10 [1] : vector<1x128xf32> to vector<1xf32>
    %33 = vector.shape_cast %32 : vector<1xf32> to vector<1x1xf32>
    %34 = vector.extract_strided_slice %30 {offsets = [0, 128], sizes = [1, 128], strides = [1, 1]} : vector<1x256xf32> to vector<1x128xf32>
    %cst_11 = arith.constant dense<0.000000e+00> : vector<1xf32>
    %35 = vector.multi_reduction <add>, %34, %cst_11 [1] : vector<1x128xf32> to vector<1xf32>
    %36 = vector.shape_cast %35 : vector<1xf32> to vector<1x1xf32>
    %37 = arith.addf %33, %36 : vector<1x1xf32>
    %c0_i32 = arith.constant 0 : i32
    %38 = arith.cmpi eq, %arg2, %c0_i32 : i32
    %39 = arith.extui %38 : i1 to i32
    %c0_i32_12 = arith.constant 0 : i32
    %40 = arith.cmpi ne, %39, %c0_i32_12 : i32
    scf.if %40 {
      %cst_21 = arith.constant 0.000000e+00 : f32
      %48 = vector.broadcast %cst_21 : f32 to vector<1x1x1x128xf32>
      %c0_22 = arith.constant 0 : index
      %c0_23 = arith.constant 0 : index
      %c0_24 = arith.constant 0 : index
      %c0_25 = arith.constant 0 : index
      %49 = vector.load %arg5[%c0_22, %c0_23, %c0_24, %c0_25] : memref<1x1x1x128xf32, #tpu.memory_space<vmem>>, vector<1x1x1x128xf32>
      tpu.vector_store %arg5[%c0_22, %c0_23, %c0_24, %c0_25], %48 {strides = array<i32>} : memref<1x1x1x128xf32, #tpu.memory_space<vmem>>, vector<1x1x1x128xf32>,
    } else {
    }
    %c0_13 = arith.constant 0 : index
    %c0_14 = arith.constant 0 : index
    %c0_15 = arith.constant 0 : index
    %c0_16 = arith.constant 0 : index
    %41 = vector.load %arg5[%c0_13, %c0_14, %c0_15, %c0_16] : memref<1x1x1x128xf32, #tpu.memory_space<vmem>>, vector<1x1x1x128xf32>
    %42 = vector.shape_cast %41 : vector<1x1x1x128xf32> to vector<1x128xf32>
    %43 = vector.broadcast %37 : vector<1x1xf32> to vector<1x128xf32>
    %44 = arith.addf %42, %43 : vector<1x128xf32>
    %c0_17 = arith.constant 0 : index
    %c0_18 = arith.constant 0 : index
    %c0_19 = arith.constant 0 : index
    %c0_20 = arith.constant 0 : index
    %45 = vector.load %arg5[%c0_17, %c0_18, %c0_19, %c0_20] : memref<1x1x1x128xf32, #tpu.memory_space<vmem>>, vector<1x1x1x128xf32>
    %46 = vector.shape_cast %45 : vector<1x1x1x128xf32> to vector<1x128xf32>
    %47 = vector.shape_cast %44 : vector<1x128xf32> to vector<1x1x1x128xf32>
    tpu.vector_store %arg5[%c0_17, %c0_18, %c0_19, %c0_20], %47 {strides = array<i32>} : memref<1x1x1x128xf32, #tpu.memory_space<vmem>>, vector<1x1x1x128xf32>,
    return
  }
  func.func @transform_0(%arg0: i32, %arg1: i32, %arg2: i32) -> (i32, i32, i32) {
    %c1_i32 = arith.constant 1 : i32
    %0 = arith.muli %arg1, %c1_i32 : i32
    %1 = arith.addi %0, %arg2 : i32
    %c0_i32 = arith.constant 0 : i32
    %c0_i32_0 = arith.constant 0 : i32
    return %arg0, %c0_i32, %1 : i32, i32, i32
  }
  func.func @transform_1(%arg0: i32, %arg1: i32, %arg2: i32) -> (i32, i32, i32) {
    %c1_i32 = arith.constant 1 : i32
    %0 = arith.muli %arg1, %c1_i32 : i32
    %1 = arith.addi %0, %arg2 : i32
    %c0_i32 = arith.constant 0 : i32
    %c0_i32_0 = arith.constant 0 : i32
    return %arg0, %c0_i32, %1 : i32, i32, i32
  }
  func.func @transform_2(%arg0: i32, %arg1: i32, %arg2: i32) -> (i32, i32, i32, i32) {
    %c0_i32 = arith.constant 0 : i32
    %c0_i32_0 = arith.constant 0 : i32
    %c0_i32_1 = arith.constant 0 : i32
    return %arg0, %arg1, %c0_i32, %c0_i32_0 : i32, i32, i32, i32
  }
}

</mosaic_0001>

<bundles_post_ra>
// kernel: tpu_custom_call.1
= control target key start
LH: loop header
LB: loop body
LE: loop exit
PB: predicated region body
PF: predicated region fallthrough
CT: control target
= control target key end

     0   :  { %7 = vsyncpa [#allocation3], 0  ;;  %s947_s0 = inlined_call_operand.hbm [shape: f32[2,4,256], index: 0, kind: input, shape index: {}]   ;;  %s948_s1 = inlined_call_operand.hbm [shape: s32[2,1,256], index: 1, kind: input, shape index: {}]   ;;  %s949_s2 = inlined_call_operand.hbm [shape: f32[2,1,1,128], index: 2, kind: output, shape index: {}]  }
   0x1   :  { %9 = vsyncpa [#allocation3 + $0x1], 0 }
   0x2   :  { %10 = vsyncpa [#allocation6], 0 }
   0x3   :  { %12 = vsyncpa [#allocation6 + $0x1], 0 }
   0x4   :  { %13 = vsyncpa [#allocation4], 0 }
   0x5   :  { %15 = vsyncpa [#allocation4 + $0x1], 0  ;;  %s725_s9 = smov 0   ;;  %s727_s10 = smov 0  }
   0x6   :  { %s729_s11 = smov 0   ;;  %s731_s12 = smov 0  }
   0x7   :  { %s733_s13 = smov 0   ;;  %s735_s14 = smov 0  }
   0x8 LB: > { %s465_s15 = sadd.s32 4294967295, %s704_s14   ;;  %s466_s16 = sadd.s32 4294967294, %s704_s14   ;;  %s704_s14 = sphi %s735_s14, %s21_s14   ;;  %s700_s13 = sphi %s733_s13, %s969_s13   ;;  %s696_s12 = sphi %s731_s12, %s968_s12   ;;  %s692_s11 = sphi %s729_s11, %s967_s11   ;;  %s688_s10 = sphi %s727_s10, %s966_s10   ;;  %s684_s9 = sphi %s725_s9, %s965_s9  }
   0x9   : > { %s40_s17 = sadd.s32 1, %s700_s13  ;;  %s51_s18 = sadd.s32 1, %s692_s11 }
   0xa   : > { %p42_p0 = scmp.ge.s32.totalorder %s40_s17, 2  ;;  %p58_p1 = scmp.ne.s32.totalorder %s692_s11, %s688_s10 }
   0xb   : > { %p59_p2 = scmp.eq.s32.totalorder %s704_s14, 0  ;;  %p64_p3 = scmp.ne.s32.totalorder %s688_s10, %s684_s9 }
   0xc   : > { %s971_s17 = smov (%p42_p0, %s40_s17), 0  ;;  %p65_p5 = scmp.eq.s32.totalorder %s465_s15, 0 }
   0xd   : > { %p766_p4 = por %p59_p2, %p58_p1  ;;  %s46_s20 = ssub.s32 %s700_s13, %s971_s17 }
   0xe   : > { %p120_p6 = scmp.eq.s32.totalorder %s465_s15, 1  ;;  %p49_p7 = scmp.eq.s32.totalorder %s46_s20, 0 }
   0xf   : > { %p772_p8 = por %p65_p5, %p64_p3  ;;  %p126_p10 = scmp.eq.s32.totalorder %s466_s16, 1 }
  0x10   : > { %p776_p9 = por %p120_p6, %p58_p1  ;;  %p500_p13 = scmp.lt.s32.totalorder %s704_s14, 2 }
  0x11   : > { %s953_s21 = scalar_select %p772_p8, 1, 0 }
  0x12   : > { %s954_s22 = scalar_select %p776_p9, 1, 0 }
  0x13   : > { %s781_s23 = scalar_select %p49_p7, %s692_s11, %s51_s18  }
  0x14   : > { %p783_p11 = por %p126_p10, %p64_p3  ;;  %s790_s25 = sand.u32 1, %s692_s11  }
  0x15   : > { %s469_s26 = sshll.u32 %s790_s25, 3  ;;  %s481_s27 = sshll.u32 %s700_s13, 7 }
  0x16   : > { %s955_s24 = scalar_select %p783_p11, 1, 0 }
  0x17   : > { %s797_s30 = scalar_lea.hbm %s947_s0, %s481_s27  ;;  %s150_s3 = scalar_lea.vmem [#allocation2], %s469_s26 }
  0x18   : > { %s161_s4 = sshll.u32 %s150_s3, 4  ;;  %p803_p0 = pnand %p500_p13, %p766_p4  ;;  %s799_s4 = int_to_ptr.vmem [resolvable:$true] %s161_s4 }
  0x19   : > { %s147_s6 = scalar_lea.sflag [#allocation3], %s790_s25  ;;  %s558_s7 = scalar_lea.hbm %s797_s30, 128 }
  0x1a   : > { %p559_p3 = scmp.ne.s32.totalorder %s797_s30, %s558_s7  ;;  %p560_p5 = pneg %p803_p0 }
  0x1b   : > { %s563_s16 = scalar_lea.hbm %s947_s0, 256  ;;  %p564_p4 = scmp.lt.u32.totalorder %s797_s30, %s947_s0 }
  0x1c   : > { %p561_p6 = pnand %p560_p5, %p559_p3  ;;  %p565_p10 = scmp.lt.u32.totalorder %s563_s16, %s558_s7 }
  0x1d   : > { %p567_p12 = scmp.lt.u32.totalorder %s558_s7, %s797_s30 }
  0x1e   : > { %p562_p7 = pneg %p561_p6  ;;  %p566_p13 = por %p565_p10, %p564_p4 }
  0x20   : > { %p568_p1 = por %p567_p12, %p566_p13 }
  0x22   : > { %p569_p2 = pnand %p568_p1, %p562_p7 }
  0x24   : > { %572 = shalt.err (!%p569_p2)
}
  0x25   : > { %s573_s20 = scalar_lea.vmem %s799_s4, 128  ;;  %s706_s26 = smov [#allocation2]  }
  0x26   : > { %p574_p3 = scmp.ne.s32.totalorder %s799_s4, %s573_s20  ;;  %s578_s27 = sshll.u32 %s706_s26, 4  ;;  %s579_s27 = int_to_ptr.vmem [resolvable:$false] %s578_s27 }
  0x27   : > { %s580_s28 = scalar_lea.vmem %s579_s27, 256  ;;  %p581_p9 = scmp.lt.s32.totalorder %s799_s4, %s579_s27 }
  0x28   : > { %p576_p6 = pnand %p574_p3, %p560_p5  ;;  %p582_p4 = scmp.lt.s32.totalorder %s580_s28, %s573_s20 }
  0x2a   : > { %p577_p11 = pneg %p576_p6  ;;  %p583_p10 = por %p582_p4, %p581_p9 }
  0x2c   : > { %p584_p12 = pnand %p583_p10, %p577_p11 }
  0x2e   : > { %587 = shalt.err (!%p584_p12)
}
  0x2f   : > { %492 = dma.hbm_to_vmem [thread:$0]  (!%p803_p0), %s797_s30, 128, %s799_s4, %s147_s6  }
  0x30   : > { %p957_p1 = scmp.lt.s32.totalorder %s704_s14, 3  ;;  %p958_p2 = scmp.ge.s32.totalorder %s704_s14, 1 }
  0x31   : > { %s472_s3 = sshll.u32 %s790_s25, 1  ;;  %s482_s7 = sshll.u32 %s700_s13, 5 }
  0x32   : > { %p839_p7 = pnand %p958_p2, %p957_p1  ;;  %s848_s16 = scalar_lea.hbm %s948_s1, %s482_s7 }
  0x33   : > { %s172_s18 = scalar_lea.vmem [#allocation5], %s472_s3  ;;  %s169_s30 = scalar_lea.sflag [#allocation6], %s790_s25 }
  0x34   : > { %s959_s29 = scalar_select %p839_p7, 1, 0 }
  0x35   : > { %s183_s19 = sshll.u32 %s172_s18, 4  ;;  %s588_s4 = scalar_lea.hbm %s848_s16, 32  ;;  %s184_s19 = int_to_ptr.vmem [resolvable:$true] %s183_s19 }
  0x36   : > { %p589_p9 = scmp.ne.s32.totalorder %s848_s16, %s588_s4  ;;  %s593_s26 = scalar_lea.hbm %s948_s1, 64 }
  0x37   : > { %p594_p3 = scmp.lt.u32.totalorder %s848_s16, %s948_s1  ;;  %p595_p6 = scmp.lt.u32.totalorder %s593_s26, %s588_s4 }
  0x38   : > { %p591_p11 = pnand %p589_p9, %p560_p5  ;;  %p597_p10 = scmp.lt.u32.totalorder %s588_s4, %s848_s16 }
  0x39   : > { %p596_p4 = por %p595_p6, %p594_p3 }
  0x3a   : > { %p592_p13 = pneg %p591_p11 }
  0x3b   : > { %p598_p12 = por %p597_p10, %p596_p4 }
  0x3d   : > { %p599_p1 = pnand %p598_p12, %p592_p13 }
  0x3f   : > { %602 = shalt.err (!%p599_p1)
}
  0x40   : > { %s603_s25 = scalar_lea.vmem %s184_s19, 32  ;;  %s707_s3 = smov [#allocation5]  }
  0x41   : > { %p604_p2 = scmp.ne.s32.totalorder %s184_s19, %s603_s25  ;;  %s608_s7 = sshll.u32 %s707_s3, 4  ;;  %s609_s7 = int_to_ptr.vmem [resolvable:$false] %s608_s7 }
  0x42   : > { %s610_s8 = scalar_lea.vmem %s609_s7, 64  ;;  %p611_p8 = scmp.lt.s32.totalorder %s184_s19, %s609_s7 }
  0x43   : > { %p606_p9 = pnand %p604_p2, %p560_p5  ;;  %p612_p7 = scmp.lt.s32.totalorder %s610_s8, %s603_s25 }
  0x45   : > { %p607_p11 = pneg %p606_p9  ;;  %p613_p3 = por %p612_p7, %p611_p8 }
  0x47   : > { %p614_p6 = pnand %p613_p3, %p607_p11 }
  0x49   : > { %617 = shalt.err (!%p614_p6)
}
  0x4a   : > { %495 = dma.hbm_to_vmem [thread:$0]  (!%p803_p0), %s848_s16, 32, %s184_s19, %s169_s30  }
  0x4b   : > { %p960_p13 = scmp.ne.s32.totalorder %s959_s29, 0 }
  0x4c   : > { %s873_s15 = sand.u32 (!%p960_p13), 1, %s688_s10   ;;  %p961_p5 = scmp.ne.s32.totalorder (!%p960_p13), %s953_s21, 0 }
  0x4d   : > { %192 = sbr.rel (%p960_p13) target bundleno = 313 (0x139), region = 28  ;;  %s476_s18 = sshll.u32 (!%p960_p13), %s873_s15, 3 }
  0x4e   : > { %s195_s4 = scalar_lea.sflag (!%p960_p13), [#allocation3], %s873_s15  ;;  %s198_s6 = scalar_lea.vmem (!%p960_p13), [#allocation2], %s476_s18 }
  0x54   : > { %671 = dma.done.wait (%p961_p5), %s195_s4, 128  }
  0x55   : > { %673 = vsyncadd (%p961_p5), %s195_s4, 4294967168  ;;  %s477_s5 = sshll.u32 %s873_s15, 1  ;;  %s204_s29 = scalar_lea.sflag [#allocation6], %s873_s15 }
  0x56   : > { %s207_s16 = scalar_lea.vmem [#allocation5], %s477_s5 }
  0x57   : > { %675 = dma.done.wait (%p961_p5), %s204_s29, 32  }
  0x58   : > { %677 = vsyncadd (%p961_p5), %s204_s29, 4294967264  ;;  %vm240_vm0 = vcmask 1043456   ;;  %v236_v0 = vld [vmem:[%s198_s6] sm:$0xff]  ;;  %v283_v13 = vlaneseq  ;;  %v295_v21 = vld [vmem:[%s207_s16] sm:$0x3]  ;;  %s231_s21 = scalar_lea.vmem [#allocation7], %s873_s15 }
  0x59   : > { %v238_v1 = vcombine.high %v236_v0, %v236_v0  ;;  %v241_v2 = vsel %vm240_vm0, %v236_v0, -inf  ;;  %s478_s19 = sshll.u32 %s696_s12, 4  ;;  %s356_s30 = sshll.u32 %s231_s21, 4  ;;  %s900_s30 = int_to_ptr.vmem [resolvable:$true] %s356_s30 }
  0x5a   : > { %v242_v3 = vrot.slane %v241_v2, 4  ;;  %v284_v17 = vshrl.u32 %v283_v13, 7  ;;  %s898_s27 = scalar_lea.hbm %s949_s2, %s478_s19  ;;  %s343_s28 = scalar_lea.sflag [#allocation4], %s873_s15 }
  0x5b   : > { %v248_v4 = vsel %vm240_vm0, %v238_v1, -inf  ;;  %v708_v1 = vmov 0.0   ;;  %s618_s25 = scalar_lea.vmem %s900_s30, 16  ;;  %p962_p0 = scmp.ne.s32.totalorder %s954_s22, 0 }
  0x5c   : > { %v243_v5 = vmax.f32 %v241_v2, %v242_v3  ;;  %v249_v6 = vrot.slane %v248_v4, 4  ;;  %v298_v20 = vsub.s32 0, %v284_v17  ;;  %v302_v23 = vsub.s32 1, %v284_v17  ;;  %338 = vst [vmem:[%s231_s21] sm:$0x1] %v708_v1  ;;  %p619_p8 = scmp.ne.s32.totalorder %s900_s30, %s618_s25  ;;  %s709_s12 = smov [#allocation7]  }
  0x5d   : > { %s622_s3 = sshll.u32 %s709_s12, 4  ;;  %s623_s3 = int_to_ptr.vmem [resolvable:$false] %s622_s3 }
  0x5e   : > { %v244_v7 = vrot.slane %v243_v5, 2  ;;  %v250_v8 = vmax.f32 %v248_v4, %v249_v6  ;;  %v299_v24 = vrot.slane %v295_v21, %v298_v20  ;;  %v303_v25 = vrot.slane %v295_v21, %v302_v23  ;;  %p620_p7 = pnand %p619_p8, %p962_p0  ;;  %s624_s7 = scalar_lea.vmem %s623_s3, 32 }
  0x5f   : > { %p625_p10 = scmp.lt.s32.totalorder %s900_s30, %s623_s3  ;;  %p626_p12 = scmp.lt.s32.totalorder %s624_s7, %s618_s25 }
  0x60   : > { %v245_v9 = vmax.f32 %v243_v5, %v244_v7  ;;  %v251_v10 = vrot.slane %v250_v8, 2  ;;  %vm304_vm1 = vcmp.eq.s32.totalorder %v284_v17, %v299_v24  ;;  %vm305_vm2 = vcmp.eq.s32.totalorder %v284_v17, %v303_v25  ;;  %p621_p4 = pneg %p620_p7 }
  0x61   : > { %p627_p1 = por %p626_p12, %p625_p10 }
  0x62   : > { %v246_v11 = vrot.slane %v245_v9, 1  ;;  %v252_v12 = vmax.f32 %v250_v8, %v251_v10 }
  0x63   : > { %v339_v3 = vld [vmem:[%s231_s21] sm:$0x1]  ;;  %p628_p2 = pnand %p627_p1, %p621_p4 }
  0x64   : > { %v247_v14 = vmax.f32 %v245_v9, %v246_v11  ;;  %v253_v15 = vrot.slane %v252_v12, 1 }
  0x66   : > { %v254_v16 = vmax.f32 %v252_v12, %v253_v15 }
  0x68   : > { %v257_v18 = vcombine.low %v247_v14, %v254_v16 }
  0x6a   : > { %v259_v19 = vsub.f32 %v236_v0, %v257_v18 }
  0x6c   : > { %v260_v22 = vmul.f32 1.442695, %v259_v19  ;;  %v307_v26 = vcombine.high %v259_v19, %v259_v19  ;;  %v309_v27 = vsel %vm304_vm1, %v259_v19, 0.0 }
  0x6d   : > { %v311_v30 = vsel %vm240_vm0, %v309_v27, 0.0 }
  0x6e   : > { %552 = vpow2.f32 %v260_v22  ;;  %v310_v28 = vsel %vm305_vm2, %v307_v26, 0.0  ;;  %v312_v35 = vrot.slane %v311_v30, 4 }
  0x6f   : > { %v318_v34 = vsel %vm240_vm0, %v310_v28, 0.0 }
  0x70   : > { %v319_v39 = vrot.slane %v318_v34, 4  ;;  %v313_v42 = vadd.f32 %v312_v35, %v311_v30 }
  0x72   : > { %v320_v45 = vadd.f32 %v319_v39, %v318_v34  ;;  %v314_v48 = vrot.slane %v313_v42, 2 }
  0x74   : > { %v321_v51 = vrot.slane %v320_v45, 2  ;;  %v315_v53 = vadd.f32 %v314_v48, %v313_v42 }
  0x76   : > { %v322_v54 = vadd.f32 %v321_v51, %v320_v45  ;;  %v316_v55 = vrot.slane %v315_v53, 1 }
  0x78   : > { %v553_v29 = vpop.eup %552  ;;  %v323_v56 = vrot.slane %v322_v54, 1  ;;  %v317_v57 = vadd.f32 %v316_v55, %v315_v53 }
  0x79   : > { %v265_v31 = vsel %vm240_vm0, %v553_v29, 0.0  ;;  %v263_v32 = vcombine.high %v553_v29, %v553_v29 }
  0x7a   : > { %v266_v33 = vrot.slane %v265_v31, 4  ;;  %v324_v60 = vadd.f32 %v323_v56, %v322_v54 }
  0x7b   : > { %v272_v36 = vsel %vm240_vm0, %v263_v32, 0.0 }
  0x7c   : > { %v267_v37 = vadd.f32 %v266_v33, %v265_v31  ;;  %v273_v38 = vrot.slane %v272_v36, 4 }
  0x7e   : > { %v268_v40 = vrot.slane %v267_v37, 2  ;;  %v274_v41 = vadd.f32 %v273_v38, %v272_v36 }
  0x80   : > { %v269_v43 = vadd.f32 %v268_v40, %v267_v37  ;;  %v275_v44 = vrot.slane %v274_v41, 2 }
  0x82   : > { %v270_v46 = vrot.slane %v269_v43, 1  ;;  %v276_v47 = vadd.f32 %v275_v44, %v274_v41 }
  0x84   : > { %v271_v49 = vadd.f32 %v270_v46, %v269_v43  ;;  %v277_v50 = vrot.slane %v276_v47, 1 }
  0x86   : > { %554 = vlog2.f32 %v271_v49  ;;  %v278_v52 = vadd.f32 %v277_v50, %v276_v47 }
  0x88   : > { %556 = vlog2.f32 %v278_v52 }
  0x90   : > { %v555_v58 = vpop.eup %554 }
  0x91   : > { %v280_v59 = vmul.f32 0.6931472, %v555_v58 }
  0x92   : > { %v557_v61 = vpop.eup %556 }
  0x93   : > { %v325_v62 = vsub.f32 %v280_v59, %v317_v57  ;;  %v282_v63 = vmul.f32 0.6931472, %v557_v61 }
  0x95   : > { %329 = vadd.xlane.f32.xlu0 %v325_v62  ;;  %v326_v0 = vsub.f32 %v282_v63, %v324_v60 }
  0x99   : > { %331 = vadd.xlane.f32.xlu0 %v326_v0 }
 0x122   : > { %v330_v2 = vpop.xlane.xlu0 %329 }
 0x126   : > { %v332_v4 = vpop.xlane.xlu0 %331 }
 0x127   : > { %v333_v5 = vadd.f32 %v332_v4, %v330_v2 }
 0x129   : > { %v340_v6 = vadd.f32 %v339_v3, %v333_v5 }
 0x12b   : > { %341 = vst [vmem:[%s231_s21] sm:$0x1] %v340_v6 }
 0x12c   : > { %631 = shalt.err (!%p628_p2)
}
 0x12d   : > { %s632_s8 = scalar_lea.hbm %s898_s27, 16  ;;  %s636_s4 = scalar_lea.hbm %s949_s2, 32 }
 0x12e   : > { %p633_p9 = scmp.ne.s32.totalorder %s898_s27, %s632_s8  ;;  %p637_p6 = scmp.lt.u32.totalorder %s898_s27, %s949_s2 }
 0x12f   : > { %p638_p13 = scmp.lt.u32.totalorder %s636_s4, %s632_s8  ;;  %p640_p8 = scmp.lt.u32.totalorder %s632_s8, %s898_s27 }
 0x130   : > { %p634_p11 = pnand %p633_p9, %p962_p0 }
 0x131   : > { %p639_p5 = por %p638_p13, %p637_p6 }
 0x132   : > { %p635_p3 = pneg %p634_p11 }
 0x133   : > { %p641_p7 = por %p640_p8, %p639_p5 }
 0x135   : > { %p642_p4 = pnand %p641_p7, %p635_p3 }
 0x137   : > { %645 = shalt.err (!%p642_p4)
}
 0x138   : > { %487 = dma.vmem_to_hbm [thread:$0]  (%p962_p0), %s900_s30, 16, %s898_s27, %s343_s28  }
 0x139 PF: > { %s368_s29 = sand.u32 1, %s684_s9   ;;  %p963_p10 = scmp.ne.s32.totalorder %s955_s24, 0 }
 0x13a   : > { %p964_p12 = scmp.ge.s32.totalorder %s704_s14, 2  ;;  %s369_s16 = scalar_lea.sflag [#allocation4], %s368_s29 }
 0x13c   : > { %p497_p1 = pnand %p964_p12, %p963_p10 }
 0x13e   : > { %679 = dma.done.wait (!%p497_p1), %s369_s16, 16  }
 0x13f   : > { %681 = vsyncadd (!%p497_p1), %s369_s16, 4294967280  ;;  %s21_s14 = sadd.s32 1, %s704_s14   ;;  %s965_s9 = smov %s688_s10 }
 0x140   : > { %p18_p2 = scmp.ge.s32.totalorder %s21_s14, 4   ;;  %s966_s10 = smov %s692_s11 }
 0x141   : > { %s967_s11 = smov %s781_s23  ;;  %s968_s12 = smov %s700_s13 }
 0x142   : > { %s969_s13 = smov %s971_s17  ;;  %20 = sbr.rel (!%p18_p2) target bundleno = 8 (0x8), region = 90 }
 0x149   :  { %373 = vsyncpa [#allocation3], 1 }
 0x14a   :  { %375 = vsyncpa [#allocation3 + $0x1], 1 }
 0x14b   :  { %376 = vsyncpa [#allocation6], 1 }
 0x14c   :  { %378 = vsyncpa [#allocation6 + $0x1], 1 }
 0x14d   :  { %379 = vsyncpa [#allocation4], 1 }
 0x14e   :  { %381 = vsyncpa [#allocation4 + $0x1], 1 }

</bundles_post_ra>
